<compile_context>
chip_gen: v7x
topology: tpu7x:2x2x1
jax: 0.10.0
libtpu: 0.0.40
codegen_flags: <defaults>
</compile_context>

<pallas_src>
import functools

import jax
import jax.numpy as jnp
from jax.experimental import pallas as pl
from jax.experimental.pallas import tpu as pltpu


def _round_up(n, m):
    return ((n + m - 1) // m) * m


# ----------------------------------------------------------------------------
# Kernel: one batch tile of the 3-layer MLP, weights resident in VMEM.
# ----------------------------------------------------------------------------
def dsb_mlp_kernel(xt_ref, w1_ref, b1_ref, w2_ref, b2_ref, w3_ref, b3_ref,
                   out_ref, *, compute_dtype, out_dim):
    xt = xt_ref[...].astype(compute_dtype)               # (tb, in_dim), K=8 dot
    h = jnp.dot(xt, w1_ref[...], preferred_element_type=jnp.float32)
    h = jnp.maximum(h + b1_ref[...], 0.0)                 # f32 epilogue (v5e-safe)

    h = jnp.dot(h.astype(compute_dtype), w2_ref[...],
                preferred_element_type=jnp.float32)
    h = jnp.maximum(h + b2_ref[...], 0.0)

    o = jnp.dot(h.astype(compute_dtype), w3_ref[...],
                preferred_element_type=jnp.float32)
    o = o + b3_ref[...]
    # Store only the true output lanes -> no 16x HBM write amplification.
    out_ref[...] = o[:, :out_dim].astype(out_ref.dtype)


# ----------------------------------------------------------------------------
# One-time parameter prep (outside the hot path): zero-pad hidden/output
# weight dims to 128 lanes (exact zeros -> math unchanged; intermediates never
# touch HBM), cast matmul operands to compute_dtype, keep biases in f32.
# ----------------------------------------------------------------------------
def prepare_dsb_params(params, compute_dtype=jnp.bfloat16, lane=128):
    w1, b1, w2, b2, w3, b3 = params
    in_dim, hidden = w1.shape
    out_dim = int(w3.shape[1])
    h_pad = _round_up(hidden, lane)
    o_pad = _round_up(out_dim, lane)

    def pad2(a, rows, cols):
        return jnp.pad(a, ((0, rows - a.shape[0]), (0, cols - a.shape[1])))

    w1p = pad2(w1, in_dim, h_pad).astype(compute_dtype)
    b1p = pad2(b1, 1, h_pad).astype(jnp.float32)
    w2p = pad2(w2, h_pad, h_pad).astype(compute_dtype)
    b2p = pad2(b2, 1, h_pad).astype(jnp.float32)
    w3p = pad2(w3, h_pad, o_pad).astype(compute_dtype)
    b3p = pad2(b3, 1, o_pad).astype(jnp.float32)
    return (w1p, b1p, w2p, b2p, w3p, b3p), out_dim


# ----------------------------------------------------------------------------
# Forward: DSBModel.forward(x, t) = MLP(concat([x, t], -1))
# ----------------------------------------------------------------------------
@functools.partial(
    jax.jit,
    static_argnames=("out_dim", "compute_dtype", "batch_tile", "out_dtype"))
def dsb_forward(x, t, prepared, out_dim, compute_dtype=jnp.bfloat16,
                batch_tile=1024, out_dtype=None):
    w1, b1, w2, b2, w3, b3 = prepared
    B = x.shape[0]
    in_dim = x.shape[1] + t.shape[1]
    assert w1.shape[0] == in_dim
    h_pad = w2.shape[0]
    o_pad = w3.shape[1]
    out_dtype = x.dtype if out_dtype is None else out_dtype

    # Fused-with-producer concat: 8 lanes wide, same bytes as two streams,
    # but one input DMA stream and one K=8 matmul inside the kernel.
    xt = jnp.concatenate([x, t], axis=-1)

    # ---- batch tiling ------------------------------------------------------
    assert batch_tile % 8 == 0
    b8 = _round_up(B, 8)                      # sublane alignment
    tb = min(batch_tile, b8)                  # large tiles: fewer grid steps
    if b8 <= batch_tile and b8 >= 16 and b8 % 16 == 0:
        # Whole batch fits in one tile: split into exactly 2 tiles so both of
        # v7x's TensorCores get work ("parallel" axis); negligible cost on the
        # single-TC v5e/v6e.
        tb = b8 // 2
    grid_n = pl.cdiv(b8, tb)
    b_pad = grid_n * tb
    if b_pad != B:
        # Only hit for ragged batches that don't divide the tile; the demo and
        # any B that is a multiple of the tile skip this copy entirely.
        xt = jnp.pad(xt, ((0, b_pad - B), (0, 0)))

    # Weights/biases: full-block, index_map always (0,0) -> DMA'd once and
    # VMEM-resident across all grid iterations.
    full = lambda a: pl.BlockSpec(a.shape, lambda i: (0, 0))

    flops = 2 * b_pad * (in_dim * h_pad + h_pad * h_pad + h_pad * o_pad)
    bytes_accessed = (
        xt.size * xt.dtype.itemsize
        + sum(a.size * a.dtype.itemsize for a in prepared)
        + b_pad * out_dim * jnp.dtype(out_dtype).itemsize)
    cost = pl.CostEstimate(flops=flops, transcendentals=0,
                           bytes_accessed=bytes_accessed)

    out = pl.pallas_call(
        functools.partial(dsb_mlp_kernel,
                          compute_dtype=compute_dtype, out_dim=out_dim),
        out_shape=jax.ShapeDtypeStruct((b_pad, out_dim), out_dtype),
        grid=(grid_n,),
        in_specs=[
            pl.BlockSpec((tb, in_dim), lambda i: (i, 0)),
            full(w1), full(b1), full(w2), full(b2), full(w3), full(b3),
        ],
        out_specs=pl.BlockSpec((tb, out_dim), lambda i: (i, 0)),
        compiler_params=pltpu.CompilerParams(
            dimension_semantics=("parallel",)),
        cost_estimate=cost,
    )(xt, w1, b1, w2, b2, w3, b3)

    return out if b_pad == B else out[:B]


# ----------------------------------------------------------------------------
# Init + pure-JAX reference
# ----------------------------------------------------------------------------
def init_dsb_params(key, input_dim, hidden_dim, output_dim, num_layers=3):
    """torch.nn.Linear-style init (uniform +-1/sqrt(fan_in)); w:[in,out], b:[1,out]."""
    assert num_layers == 3, "this script instantiates the default num_layers=3"
    dims = [(input_dim, hidden_dim), (hidden_dim, hidden_dim),
            (hidden_dim, output_dim)]
    params = []
    for fan_in, fan_out in dims:
        key, kw, kb = jax.random.split(key, 3)
        bound = 1.0 / jnp.sqrt(jnp.float32(fan_in))
        w = jax.random.uniform(kw, (fan_in, fan_out), jnp.float32,
                               minval=-bound, maxval=bound)
        b = jax.random.uniform(kb, (1, fan_out), jnp.float32,
                               minval=-bound, maxval=bound)
        params += [w, b]
    return tuple(params)


def dsb_forward_ref(x, t, params):
    w1, b1, w2, b2, w3, b3 = params
    h = jnp.concatenate([x, t], axis=-1)
    h = jnp.maximum(h @ w1 + b1, 0.0)
    h = jnp.maximum(h @ w2 + b2, 0.0)
    return h @ w3 + b3


if __name__ == "__main__":
    # DSBModel shapes: input_dim = dim(concat([x, t])); output_dim defaults to
    # input_dim. Batch chosen so the grid has 2 tiles (both v7x TCs fed).
    B, X_DIM, T_DIM = 256, 7, 1
    INPUT_DIM = X_DIM + T_DIM          # 8
    HIDDEN_DIM = 32
    OUTPUT_DIM = INPUT_DIM             # default output_dim = input_dim

    key = jax.random.PRNGKey(0)
    key, kx, kt = jax.random.split(key, 3)
    x = jax.random.normal(kx, (B, X_DIM), jnp.float32)
    t = jax.random.uniform(kt, (B, T_DIM), jnp.float32)

    params = init_dsb_params(key, INPUT_DIM, HIDDEN_DIM, OUTPUT_DIM,
                             num_layers=3)
    ref = dsb_forward_ref(x, t, params)

    # f32 matmul operands: tight check against the reference.
    prep_f32, out_dim = prepare_dsb_params(params, compute_dtype=jnp.float32)
    out_f32 = jax.block_until_ready(
        dsb_forward(x, t, prep_f32, out_dim, compute_dtype=jnp.float32))
    assert out_f32.shape == (B, OUTPUT_DIM)
    assert jnp.allclose(out_f32, ref, atol=1e-4, rtol=1e-4), "f32 mismatch"

    # bf16 matmul operands (recommended on v6e/v7x), f32 accumulation:
    # looser tolerance vs the f32 reference.
    prep_bf16, _ = prepare_dsb_params(params, compute_dtype=jnp.bfloat16)
    out_bf16 = jax.block_until_ready(
        dsb_forward(x, t, prep_bf16, out_dim, compute_dtype=jnp.bfloat16))
    assert out_bf16.shape == (B, OUTPUT_DIM)
    assert jnp.allclose(out_bf16, ref, atol=5e-2, rtol=5e-2), "bf16 mismatch"

    print("KERNEL_OK")
</pallas_src>

<mosaic_0001>
module attributes {stable_mosaic.version = 11 : i64} {
  func.func @dsb_mlp_kernel(%arg0: i32, %arg1: memref<128x8xf32, #tpu.memory_space<vmem>>, %arg2: memref<8x128xf32, #tpu.memory_space<vmem>>, %arg3: memref<1x128xf32, #tpu.memory_space<vmem>>, %arg4: memref<128x128xf32, #tpu.memory_space<vmem>>, %arg5: memref<1x128xf32, #tpu.memory_space<vmem>>, %arg6: memref<128x128xf32, #tpu.memory_space<vmem>>, %arg7: memref<1x128xf32, #tpu.memory_space<vmem>>, %arg8: memref<128x8xf32, #tpu.memory_space<vmem>>) attributes {dimension_semantics = [#tpu.dimension_semantics<parallel>], iteration_bounds = array<i64: 2>, scalar_prefetch = 0 : i64, scratch_operands = 0 : i64, tpu.core_type = #tpu.core_type<tc>, window_params = [{transform_indices = @transform_0, window_bounds = array<i64: 128, 8>}, {pipeline_mode = #tpu.pipeline_mode<synchronous>, transform_indices = @transform_1, window_bounds = array<i64: 8, 128>}, {pipeline_mode = #tpu.pipeline_mode<synchronous>, transform_indices = @transform_2, window_bounds = array<i64: 1, 128>}, {pipeline_mode = #tpu.pipeline_mode<synchronous>, transform_indices = @transform_3, window_bounds = array<i64: 128, 128>}, {pipeline_mode = #tpu.pipeline_mode<synchronous>, transform_indices = @transform_4, window_bounds = array<i64: 1, 128>}, {pipeline_mode = #tpu.pipeline_mode<synchronous>, transform_indices = @transform_5, window_bounds = array<i64: 128, 128>}, {pipeline_mode = #tpu.pipeline_mode<synchronous>, transform_indices = @transform_6, window_bounds = array<i64: 1, 128>}, {transform_indices = @transform_7, window_bounds = array<i64: 128, 8>}]} {
    %c0 = arith.constant 0 : index
    %c0_0 = arith.constant 0 : index
    %0 = vector.load %arg1[%c0, %c0_0] : memref<128x8xf32, #tpu.memory_space<vmem>>, vector<128x8xf32>
    %c0_1 = arith.constant 0 : index
    %c0_2 = arith.constant 0 : index
    %1 = vector.load %arg2[%c0_1, %c0_2] : memref<8x128xf32, #tpu.memory_space<vmem>>, vector<8x128xf32>
    %cst = arith.constant dense<0.000000e+00> : vector<128x128xf32>
    %2 = tpu.matmul %0, %1, %cst {dimension_numbers = #tpu.dot_dimension_numbers<[1], [0], [0], [1], [0, 0, 1, 1], [], []>} : vector<128x8xf32>, vector<8x128xf32>, vector<128x128xf32> -> vector<128x128xf32>
    %c0_3 = arith.constant 0 : index
    %c0_4 = arith.constant 0 : index
    %3 = vector.load %arg3[%c0_3, %c0_4] : memref<1x128xf32, #tpu.memory_space<vmem>>, vector<1x128xf32>
    %4 = vector.broadcast %3 : vector<1x128xf32> to vector<128x128xf32>
    %5 = arith.addf %2, %4 : vector<128x128xf32>
    %cst_5 = arith.constant 0.000000e+00 : f32
    %6 = vector.broadcast %cst_5 : f32 to vector<128x128xf32>
    %7 = arith.maximumf %5, %6 : vector<128x128xf32>
    %c0_6 = arith.constant 0 : index
    %c0_7 = arith.constant 0 : index
    %8 = vector.load %arg4[%c0_6, %c0_7] : memref<128x128xf32, #tpu.memory_space<vmem>>, vector<128x128xf32>
    %cst_8 = arith.constant dense<0.000000e+00> : vector<128x128xf32>
    %9 = tpu.matmul %7, %8, %cst_8 {dimension_numbers = #tpu.dot_dimension_numbers<[1], [0], [0], [1], [0, 0, 1, 1], [], []>} : vector<128x128xf32>, vector<128x128xf32>, vector<128x128xf32> -> vector<128x128xf32>
    %c0_9 = arith.constant 0 : index
    %c0_10 = arith.constant 0 : index
    %10 = vector.load %arg5[%c0_9, %c0_10] : memref<1x128xf32, #tpu.memory_space<vmem>>, vector<1x128xf32>
    %11 = vector.broadcast %10 : vector<1x128xf32> to vector<128x128xf32>
    %12 = arith.addf %9, %11 : vector<128x128xf32>
    %cst_11 = arith.constant 0.000000e+00 : f32
    %13 = vector.broadcast %cst_11 : f32 to vector<128x128xf32>
    %14 = arith.maximumf %12, %13 : vector<128x128xf32>
    %c0_12 = arith.constant 0 : index
    %c0_13 = arith.constant 0 : index
    %15 = vector.load %arg6[%c0_12, %c0_13] : memref<128x128xf32, #tpu.memory_space<vmem>>, vector<128x128xf32>
    %cst_14 = arith.constant dense<0.000000e+00> : vector<128x128xf32>
    %16 = tpu.matmul %14, %15, %cst_14 {dimension_numbers = #tpu.dot_dimension_numbers<[1], [0], [0], [1], [0, 0, 1, 1], [], []>} : vector<128x128xf32>, vector<128x128xf32>, vector<128x128xf32> -> vector<128x128xf32>
    %c0_15 = arith.constant 0 : index
    %c0_16 = arith.constant 0 : index
    %17 = vector.load %arg7[%c0_15, %c0_16] : memref<1x128xf32, #tpu.memory_space<vmem>>, vector<1x128xf32>
    %18 = vector.broadcast %17 : vector<1x128xf32> to vector<128x128xf32>
    %19 = arith.addf %16, %18 : vector<128x128xf32>
    %20 = vector.extract_strided_slice %19 {offsets = [0, 0], sizes = [128, 8], strides = [1, 1]} : vector<128x128xf32> to vector<128x8xf32>
    %c0_17 = arith.constant 0 : index
    %c0_18 = arith.constant 0 : index
    %21 = vector.load %arg8[%c0_17, %c0_18] : memref<128x8xf32, #tpu.memory_space<vmem>>, vector<128x8xf32>
    tpu.vector_store %arg8[%c0_17, %c0_18], %20 {strides = array<i32>} : memref<128x8xf32, #tpu.memory_space<vmem>>, vector<128x8xf32>,
    return
  }
  func.func @transform_0(%arg0: i32) -> (i32, i32) {
    %c0_i32 = arith.constant 0 : i32
    %c0_i32_0 = arith.constant 0 : i32
    return %arg0, %c0_i32 : i32, i32
  }
  func.func @transform_1(%arg0: i32) -> (i32, i32) {
    %c0_i32 = arith.constant 0 : i32
    %c0_i32_0 = arith.constant 0 : i32
    %c0_i32_1 = arith.constant 0 : i32
    return %c0_i32, %c0_i32_0 : i32, i32
  }
  func.func @transform_2(%arg0: i32) -> (i32, i32) {
    %c0_i32 = arith.constant 0 : i32
    %c0_i32_0 = arith.constant 0 : i32
    %c0_i32_1 = arith.constant 0 : i32
    return %c0_i32, %c0_i32_0 : i32, i32
  }
  func.func @transform_3(%arg0: i32) -> (i32, i32) {
    %c0_i32 = arith.constant 0 : i32
    %c0_i32_0 = arith.constant 0 : i32
    %c0_i32_1 = arith.constant 0 : i32
    return %c0_i32, %c0_i32_0 : i32, i32
  }
  func.func @transform_4(%arg0: i32) -> (i32, i32) {
    %c0_i32 = arith.constant 0 : i32
    %c0_i32_0 = arith.constant 0 : i32
    %c0_i32_1 = arith.constant 0 : i32
    return %c0_i32, %c0_i32_0 : i32, i32
  }
  func.func @transform_5(%arg0: i32) -> (i32, i32) {
    %c0_i32 = arith.constant 0 : i32
    %c0_i32_0 = arith.constant 0 : i32
    %c0_i32_1 = arith.constant 0 : i32
    return %c0_i32, %c0_i32_0 : i32, i32
  }
  func.func @transform_6(%arg0: i32) -> (i32, i32) {
    %c0_i32 = arith.constant 0 : i32
    %c0_i32_0 = arith.constant 0 : i32
    %c0_i32_1 = arith.constant 0 : i32
    return %c0_i32, %c0_i32_0 : i32, i32
  }
  func.func @transform_7(%arg0: i32) -> (i32, i32) {
    %c0_i32 = arith.constant 0 : i32
    %c0_i32_0 = arith.constant 0 : i32
    return %arg0, %c0_i32 : i32, i32
  }
}

</mosaic_0001>

<bundles_post_ra>
// kernel: dsb_forward.1
= control target key start
LH: loop header
LB: loop body
LE: loop exit
PB: predicated region body
PF: predicated region fallthrough
CT: control target
= control target key end

     0   :  { %s1309_s24 = smov 0   ;;  %s1509_s0 = inlined_call_operand.vmem [shape: f32[256,8], index: 0, kind: input, shape index: {}]   ;;  %s1510_s1 = inlined_call_operand.vmem [shape: f32[8,128], index: 1, kind: input, shape index: {}]   ;;  %s1511_s2 = inlined_call_operand.vmem [shape: f32[1,128], index: 2, kind: input, shape index: {}]   ;;  %s1512_s3 = inlined_call_operand.vmem [shape: f32[128,128], index: 3, kind: input, shape index: {}]   ;;  %s1513_s4 = inlined_call_operand.vmem [shape: f32[1,128], index: 4, kind: input, shape index: {}]   ;;  %s1514_s5 = inlined_call_operand.vmem [shape: f32[128,128], index: 5, kind: input, shape index: {}]   ;;  %s1515_s6 = inlined_call_operand.vmem [shape: f32[1,128], index: 6, kind: input, shape index: {}]   ;;  %s1516_s7 = inlined_call_operand.vmem [shape: f32[256,8], index: 7, kind: output, shape index: {}]  }
   0x1 LB: > { %s940_s25 = sadd.s32 4294967295, %s1267_s24   ;;  %p944_p0 = scmp.ge.s32.totalorder %s1267_s24, 1  ;;  %s1267_s24 = sphi %s1309_s24, %s17_s24  }
   0x2   : > { %p238_p1 = scmp.lt.s32.totalorder %s1267_s24, 3 }
   0x4   : > { %p239_p2 = pnand %p944_p0, %p238_p1 }
   0x5   : > { %v298_v0 = vld [vmem:[%s1510_s1] sm:$0xff] (!%p239_p2)  ;;  %s945_s28 = sshll.u32 (!%p239_p2), %s940_s25, 4  ;;  %v517_v2 = vld [vmem:[%s1512_s3 + $0x8] sm:$0xff] (!%p239_p2)  ;;  %v518_v4 = vld [vmem:[%s1512_s3 + $0x10] sm:$0xff] (!%p239_p2)  ;;  %vm306_vm0 = vcmask (!%p239_p2), 64512  }
   0x6   : > { %242 = sbr.rel (%p239_p2) target bundleno = 698 (0x2ba), region = 48  ;;  %v516_v1 = vld [vmem:[%s1512_s3] sm:$0xff] (!%p239_p2)  ;;  %1051 = vmatprep.subr.mxu0 (!%p239_p2), %v298_v0  ;;  %p271_p3 = scmp.lt.s32.totalorder (!%p239_p2), %s945_s28, 31  ;;  %v519_v5 = vld [vmem:[%s1512_s3 + $0x18] sm:$0xff] (!%p239_p2)  ;;  %v521_v8 = vld [vmem:[%s1512_s3 + $0x28] sm:$0xff] (!%p239_p2) }
   0x7   : > { %v1189_v3 = vpack.c.bf16 (!%p239_p2), %v517_v2, %v516_v1  ;;  %1052 = vmatpush3.msra.mxu0 (!%p239_p2), %v298_v0  ;;  %v1193_v6 = vpack.c.bf16 (!%p239_p2), %v519_v5, %v518_v4  ;;  %v520_v7 = vld [vmem:[%s1512_s3 + $0x20] sm:$0xff] (!%p239_p2)  ;;  %v522_v10 = vld [vmem:[%s1512_s3 + $0x30] sm:$0xff] (!%p239_p2)  ;;  %v523_v11 = vld [vmem:[%s1512_s3 + $0x38] sm:$0xff] (!%p239_p2) }
   0x8   : > { %v1197_v9 = vpack.c.bf16 (!%p239_p2), %v521_v8, %v520_v7  ;;  %v1201_v15 = vpack.c.bf16 (!%p239_p2), %v523_v11, %v522_v10  ;;  %v524_v17 = vld [vmem:[%s1512_s3 + $0x40] sm:$0xff] (!%p239_p2)  ;;  %v525_v18 = vld [vmem:[%s1512_s3 + $0x48] sm:$0xff] (!%p239_p2)  ;;  %v526_v22 = vld [vmem:[%s1512_s3 + $0x50] sm:$0xff] (!%p239_p2) }
   0x9   : > { %1190 = vmatprep.subr.bf16.mxu1 (!%p239_p2), %v1189_v3  ;;  %v1205_v20 = vpack.c.bf16 (!%p239_p2), %v525_v18, %v524_v17  ;;  %v527_v23 = vld [vmem:[%s1512_s3 + $0x58] sm:$0xff] (!%p239_p2)  ;;  %v528_v27 = vld [vmem:[%s1512_s3 + $0x60] sm:$0xff] (!%p239_p2)  ;;  %v529_v28 = vld [vmem:[%s1512_s3 + $0x68] sm:$0xff] (!%p239_p2) }
   0xa   : > { %1192 = vmatpush3.bf16.msra.mxu1 (!%p239_p2), %v1189_v3  ;;  %v1209_v25 = vpack.c.bf16 (!%p239_p2), %v527_v23, %v526_v22  ;;  %v1213_v30 = vpack.c.bf16 (!%p239_p2), %v529_v28, %v528_v27  ;;  %v530_v38 = vld [vmem:[%s1512_s3 + $0x70] sm:$0xff] (!%p239_p2)  ;;  %v531_v39 = vld [vmem:[%s1512_s3 + $0x78] sm:$0xff] (!%p239_p2)  ;;  %v700_v41 = vld [vmem:[%s1514_s5] sm:$0xff] (!%p239_p2) }
   0xb   : > { %1194 = vmatprep.subr.bf16.mxu1 (!%p239_p2), %v1193_v6  ;;  %v1217_v40 = vpack.c.bf16 (!%p239_p2), %v531_v39, %v530_v38  ;;  %v701_v42 = vld [vmem:[%s1514_s5 + $0x8] sm:$0xff] (!%p239_p2)  ;;  %v702_v43 = vld [vmem:[%s1514_s5 + $0x10] sm:$0xff] (!%p239_p2)  ;;  %v703_v45 = vld [vmem:[%s1514_s5 + $0x18] sm:$0xff] (!%p239_p2) }
   0xc   : > { %v1221_v44 = vpack.c.bf16 (!%p239_p2), %v701_v42, %v700_v41  ;;  %v1225_v46 = vpack.c.bf16 (!%p239_p2), %v703_v45, %v702_v43  ;;  %v704_v47 = vld [vmem:[%s1514_s5 + $0x20] sm:$0xff] (!%p239_p2)  ;;  %v705_v48 = vld [vmem:[%s1514_s5 + $0x28] sm:$0xff] (!%p239_p2)  ;;  %v706_v50 = vld [vmem:[%s1514_s5 + $0x30] sm:$0xff] (!%p239_p2) }
   0xd   : > { %s1518_s28 = smov (!%p271_p3, %s945_s28), 31  ;;  %v1229_v49 = vpack.c.bf16 %v705_v48, %v704_v47  ;;  %v707_v51 = vld [vmem:[%s1514_s5 + $0x38] sm:$0xff]  ;;  %v708_v53 = vld [vmem:[%s1514_s5 + $0x40] sm:$0xff]  ;;  %v709_v54 = vld [vmem:[%s1514_s5 + $0x48] sm:$0xff] }
   0xe   : > { %s946_s18 = sshll.u32 %s1518_s28, 3  ;;  %1196 = vmatpush3.bf16.msra.mxu1 %v1193_v6  ;;  %1222 = vmatprep.subr.bf16.mxu0 %v1221_v44  ;;  %v1233_v52 = vpack.c.bf16 %v707_v51, %v706_v50  ;;  %v1237_v55 = vpack.c.bf16 %v709_v54, %v708_v53  ;;  %v710_v56 = vld [vmem:[%s1514_s5 + $0x50] sm:$0xff]  ;;  %v711_v57 = vld [vmem:[%s1514_s5 + $0x58] sm:$0xff]  ;;  %v712_v59 = vld [vmem:[%s1514_s5 + $0x60] sm:$0xff] }
   0xf   : > { %s1346_s21 = scalar_lea.vmem %s1509_s0, %s946_s18  ;;  %1198 = vmatprep.subr.bf16.mxu1 %v1197_v9  ;;  %v1241_v58 = vpack.c.bf16 %v711_v57, %v710_v56  ;;  %v713_v60 = vld [vmem:[%s1514_s5 + $0x68] sm:$0xff]  ;;  %v949_v62 = vld [vmem:[%s1511_s2] ss:$0 sm:$0xff]  ;;  %v714_v47 = vld [vmem:[%s1514_s5 + $0x70] sm:$0xff]  ;;  %s1472_s23 = scalar_lea.vmem %s1516_s7, %s946_s18 }
  0x10   : > { %v282_v12 = vld [vmem:[%s1346_s21] sm:$0xff]  ;;  %v283_v13 = vld [vmem:[%s1346_s21 + $0x8] sm:$0xff]  ;;  %v284_v14 = vld [vmem:[%s1346_s21 + $0x10] sm:$0xff]  ;;  %v1245_v61 = vpack.c.bf16 %v713_v60, %v712_v59 }
  0x11   : > { %1053 = vmatprep.mubr.msk.f32.mxu0 %vm306_vm0, %v282_v12  ;;  %v285_v16 = vld [vmem:[%s1346_s21 + $0x18] sm:$0xff]  ;;  %v286_v19 = vld [vmem:[%s1346_s21 + $0x20] sm:$0xff]  ;;  %v287_v21 = vld [vmem:[%s1346_s21 + $0x28] sm:$0xff] }
  0x12   : > { %1054 = vmatmul.mubr.msk.f32.vlgmr.msra.gmra.mrb[0].mxu0 %vm306_vm0, %v283_v13  ;;  %1200 = vmatpush3.bf16.msra.mxu1 %v1197_v9  ;;  %v288_v24 = vld [vmem:[%s1346_s21 + $0x30] sm:$0xff]  ;;  %v289_v26 = vld [vmem:[%s1346_s21 + $0x38] sm:$0xff]  ;;  %v290_v29 = vld [vmem:[%s1346_s21 + $0x40] sm:$0xff] }
  0x13   : > { %1056 = vmatprep.mubr.msk.f32.mxu0 %vm306_vm0, %v284_v14  ;;  %1202 = vmatprep.subr.bf16.mxu1 %v1201_v15  ;;  %v291_v31 = vld [vmem:[%s1346_s21 + $0x48] sm:$0xff]  ;;  %v292_v32 = vld [vmem:[%s1346_s21 + $0x50] sm:$0xff]  ;;  %v293_v33 = vld [vmem:[%s1346_s21 + $0x58] sm:$0xff] }
  0x14   : > { %v294_v34 = vld [vmem:[%s1346_s21 + $0x60] sm:$0xff]  ;;  %v295_v35 = vld [vmem:[%s1346_s21 + $0x68] sm:$0xff]  ;;  %v296_v36 = vld [vmem:[%s1346_s21 + $0x70] sm:$0xff]  ;;  %1224 = vmatpush3.bf16.msra.mxu0 %v1221_v44 }
  0x15   : > { %v297_v37 = vld [vmem:[%s1346_s21 + $0x78] sm:$0xff]  ;;  %1226 = vmatprep.subr.bf16.mxu0 %v1225_v46  ;;  %v966_v50 = vld [vmem:[%s1513_s4] ss:$0 sm:$0xff] }
  0x16   : > { %1057 = vmatmul.mubr.msk.f32.gmra.mrb[2].mxu0 %vm306_vm0, %v285_v16  ;;  %1204 = vmatpush3.bf16.msra.mxu1 %v1201_v15  ;;  %v715_v48 = vld [vmem:[%s1514_s5 + $0x78] sm:$0xff] }
  0x17   : > { %1059 = vmatprep.mubr.msk.f32.mxu0 %vm306_vm0, %v286_v19  ;;  %1206 = vmatprep.subr.bf16.mxu1 %v1205_v20 }
  0x18   : > { %1228 = vmatpush3.bf16.msra.mxu0 %v1225_v46 }
  0x19   : > { %1230 = vmatprep.subr.bf16.mxu0 %v1229_v49 }
  0x1a   : > { %1060 = vmatmul.mubr.msk.f32.gmra.mrb[4].mxu0 %vm306_vm0, %v287_v21  ;;  %1208 = vmatpush3.bf16.msra.mxu1 %v1205_v20 }
  0x1b   : > { %1062 = vmatprep.mubr.msk.f32.mxu0 %vm306_vm0, %v288_v24  ;;  %1210 = vmatprep.subr.bf16.mxu1 %v1209_v25 }
  0x1c   : > { %1232 = vmatpush3.bf16.msra.mxu0 %v1229_v49  ;;  %v1249_v49 = vpack.c.bf16 %v715_v48, %v714_v47 }
  0x1d   : > { %1234 = vmatprep.subr.bf16.mxu0 %v1233_v52 }
  0x1e   : > { %1063 = vmatmul.mubr.msk.f32.gmra.mrb[6].mxu0 %vm306_vm0, %v289_v26  ;;  %1212 = vmatpush3.bf16.msra.mxu1 %v1209_v25 }
  0x1f   : > { %1065 = vmatprep.mubr.msk.f32.mxu0 %vm306_vm0, %v290_v29  ;;  %1214 = vmatprep.subr.bf16.mxu1 %v1213_v30 }
  0x20   : > { %1236 = vmatpush3.bf16.msra.mxu0 %v1233_v52 }
  0x21   : > { %1238 = vmatprep.subr.bf16.mxu0 %v1237_v55 }
  0x22   : > { %1066 = vmatmul.mubr.msk.f32.gmra.mrb[8].mxu0 %vm306_vm0, %v291_v31  ;;  %1216 = vmatpush3.bf16.msra.mxu1 %v1213_v30 }
  0x23   : > { %1068 = vmatprep.mubr.msk.f32.mxu0 %vm306_vm0, %v292_v32  ;;  %1218 = vmatprep.subr.bf16.mxu1 %v1217_v40 }
  0x24   : > { %1240 = vmatpush3.bf16.msra.mxu0 %v1237_v55 }
  0x25   : > { %1242 = vmatprep.subr.bf16.mxu0 %v1241_v58 }
  0x26   : > { %1069 = vmatmul.mubr.msk.f32.gmra.mrb[10].mxu0 %vm306_vm0, %v293_v33  ;;  %1220 = vmatpush3.bf16.msra.mxu1 %v1217_v40 }
  0x27   : > { %1071 = vmatprep.mubr.msk.f32.mxu0 %vm306_vm0, %v294_v34 }
  0x28   : > { %1244 = vmatpush3.bf16.msra.mxu0 %v1241_v58 }
  0x29   : > { %1246 = vmatprep.subr.bf16.mxu0 %v1245_v61 }
  0x2a   : > { %1072 = vmatmul.mubr.msk.f32.gmra.mrb[12].mxu0 %vm306_vm0, %v295_v35 }
  0x2b   : > { %1074 = vmatprep.mubr.msk.f32.mxu0 %vm306_vm0, %v296_v36 }
  0x2c   : > { %1248 = vmatpush3.bf16.msra.mxu0 %v1245_v61 }
  0x2d   : > { %1250 = vmatprep.subr.bf16.mxu0 %v1249_v49 }
  0x2e   : > { %1075 = vmatmul.mubr.msk.f32.gmra.mrb[14].mxu0 %vm306_vm0, %v297_v37 }
  0x30   : > { %1252 = vmatpush3.bf16.msra.mxu0 %v1249_v49 }
  0xe5   : > { %v1055_v63 = vpop.f32.mrb[0].mxu0 }
  0xe6   : > { %v427_v0 = vadd.f32 %v1055_v63, %v949_v62  ;;  %v421_v1 = vpop.f32.mrb[1].mxu0 }
  0xe7   : > { %v422_v2 = vadd.f32 %v949_v62, %v421_v1 }
  0xe8   : > { %v501_v5 = vmax.f32 %v427_v0, 0.0 }
  0xe9   : > { %v1058_v3 = vpop.f32.mrb[2].mxu0  ;;  %v500_v4 = vmax.f32 %v422_v2, 0.0 }
  0xea   : > { %v437_v6 = vadd.f32 %v1058_v3, %v949_v62  ;;  %v431_v7 = vpop.f32.mrb[3].mxu0 }
  0xeb   : > { %v432_v8 = vadd.f32 %v949_v62, %v431_v7  ;;  %1109 = vmatprep.mubr.f32.mxu1 %v500_v4 }
  0xec   : > { %1110 = vmatmul.mubr.f32.vlgmr.msra.gmra.mrb[0].mxu1 %v501_v5  ;;  %v503_v11 = vmax.f32 %v437_v6, 0.0 }
  0xed   : > { %v502_v9 = vmax.f32 %v432_v8, 0.0  ;;  %v1061_v10 = vpop.f32.mrb[4].mxu0 }
  0xee   : > { %v447_v12 = vadd.f32 %v1061_v10, %v949_v62  ;;  %v441_v13 = vpop.f32.mrb[5].mxu0 }
  0xef   : > { %v442_v14 = vadd.f32 %v949_v62, %v441_v13  ;;  %1112 = vmatprep.mubr.f32.mxu1 %v502_v9 }
  0xf0   : > { %1113 = vmatmul.mubr.f32.gmra.mrb[2].mxu1 %v503_v11  ;;  %v505_v17 = vmax.f32 %v447_v12, 0.0 }
  0xf1   : > { %v504_v15 = vmax.f32 %v442_v14, 0.0  ;;  %v1064_v16 = vpop.f32.mrb[6].mxu0 }
  0xf2   : > { %v457_v18 = vadd.f32 %v1064_v16, %v949_v62  ;;  %v451_v19 = vpop.f32.mrb[7].mxu0 }
  0xf3   : > { %v452_v20 = vadd.f32 %v949_v62, %v451_v19  ;;  %1115 = vmatprep.mubr.f32.mxu1 %v504_v15 }
  0xf4   : > { %1116 = vmatmul.mubr.f32.gmra.mrb[4].mxu1 %v505_v17  ;;  %v507_v23 = vmax.f32 %v457_v18, 0.0 }
  0xf5   : > { %v506_v21 = vmax.f32 %v452_v20, 0.0  ;;  %v1067_v22 = vpop.f32.mrb[8].mxu0 }
  0xf6   : > { %v467_v24 = vadd.f32 %v1067_v22, %v949_v62  ;;  %v461_v25 = vpop.f32.mrb[9].mxu0 }
  0xf7   : > { %v462_v26 = vadd.f32 %v949_v62, %v461_v25  ;;  %1118 = vmatprep.mubr.f32.mxu1 %v506_v21 }
  0xf8   : > { %1119 = vmatmul.mubr.f32.gmra.mrb[6].mxu1 %v507_v23  ;;  %v509_v29 = vmax.f32 %v467_v24, 0.0 }
  0xf9   : > { %v508_v27 = vmax.f32 %v462_v26, 0.0  ;;  %v1070_v28 = vpop.f32.mrb[10].mxu0 }
  0xfa   : > { %v477_v30 = vadd.f32 %v1070_v28, %v949_v62  ;;  %v471_v31 = vpop.f32.mrb[11].mxu0 }
  0xfb   : > { %v472_v32 = vadd.f32 %v949_v62, %v471_v31  ;;  %1121 = vmatprep.mubr.f32.mxu1 %v508_v27 }
  0xfc   : > { %1122 = vmatmul.mubr.f32.gmra.mrb[8].mxu1 %v509_v29  ;;  %v511_v35 = vmax.f32 %v477_v30, 0.0 }
  0xfd   : > { %v510_v33 = vmax.f32 %v472_v32, 0.0  ;;  %v1073_v34 = vpop.f32.mrb[12].mxu0 }
  0xfe   : > { %v487_v36 = vadd.f32 %v1073_v34, %v949_v62  ;;  %v481_v37 = vpop.f32.mrb[13].mxu0 }
  0xff   : > { %v482_v38 = vadd.f32 %v949_v62, %v481_v37  ;;  %1124 = vmatprep.mubr.f32.mxu1 %v510_v33 }
 0x100   : > { %1125 = vmatmul.mubr.f32.gmra.mrb[10].mxu1 %v511_v35  ;;  %v513_v41 = vmax.f32 %v487_v36, 0.0  ;;  %v967_v35 = vld [vmem:[%s1515_s6] ss:$0 sm:$0xff] }
 0x101   : > { %v512_v39 = vmax.f32 %v482_v38, 0.0  ;;  %v1076_v40 = vpop.f32.mrb[14].mxu0 }
 0x102   : > { %v497_v42 = vadd.f32 %v1076_v40, %v949_v62  ;;  %v491_v43 = vpop.f32.mrb[15].mxu0 }
 0x103   : > { %v492_v44 = vadd.f32 %v949_v62, %v491_v43  ;;  %1127 = vmatprep.mubr.f32.mxu1 %v512_v39 }
 0x104   : > { %1128 = vmatmul.mubr.f32.gmra.mrb[12].mxu1 %v513_v41  ;;  %v515_v46 = vmax.f32 %v497_v42, 0.0 }
 0x105   : > { %v514_v45 = vmax.f32 %v492_v44, 0.0 }
 0x107   : > { %1130 = vmatprep.mubr.f32.mxu1 %v514_v45 }
 0x108   : > { %1131 = vmatmul.mubr.f32.gmra.mrb[14].mxu1 %v515_v46 }
 0x1bf   : > { %v1111_v51 = vpop.f32.mrb[0].mxu1 }
 0x1c0   : > { %v611_v52 = vadd.f32 %v1111_v51, %v966_v50  ;;  %v605_v53 = vpop.f32.mrb[1].mxu1 }
 0x1c1   : > { %v606_v54 = vadd.f32 %v966_v50, %v605_v53 }
 0x1c2   : > { %v685_v57 = vmax.f32 %v611_v52, 0.0 }
 0x1c3   : > { %v684_v55 = vmax.f32 %v606_v54, 0.0  ;;  %v1114_v56 = vpop.f32.mrb[2].mxu1 }
 0x1c4   : > { %v621_v58 = vadd.f32 %v1114_v56, %v966_v50  ;;  %v615_v59 = vpop.f32.mrb[3].mxu1 }
 0x1c5   : > { %v616_v60 = vadd.f32 %v966_v50, %v615_v59  ;;  %1165 = vmatprep.mubr.f32.mxu0 %v684_v55 }
 0x1c6   : > { %1166 = vmatmul.mubr.f32.vlgmr.msra.gmra.mrb[16].mxu0 %v685_v57  ;;  %v687_v63 = vmax.f32 %v621_v58, 0.0 }
 0x1c7   : > { %v686_v61 = vmax.f32 %v616_v60, 0.0  ;;  %v1117_v62 = vpop.f32.mrb[4].mxu1 }
 0x1c8   : > { %v631_v0 = vadd.f32 %v1117_v62, %v966_v50  ;;  %v625_v1 = vpop.f32.mrb[5].mxu1 }
 0x1c9   : > { %v626_v2 = vadd.f32 %v966_v50, %v625_v1  ;;  %1168 = vmatprep.mubr.f32.mxu0 %v686_v61 }
 0x1ca   : > { %1169 = vmatmul.mubr.f32.gmra.mrb[18].mxu0 %v687_v63  ;;  %v689_v5 = vmax.f32 %v631_v0, 0.0 }
 0x1cb   : > { %v688_v3 = vmax.f32 %v626_v2, 0.0  ;;  %v1120_v4 = vpop.f32.mrb[6].mxu1 }
 0x1cc   : > { %v641_v6 = vadd.f32 %v1120_v4, %v966_v50  ;;  %v635_v7 = vpop.f32.mrb[7].mxu1 }
 0x1cd   : > { %v636_v8 = vadd.f32 %v966_v50, %v635_v7  ;;  %1171 = vmatprep.mubr.f32.mxu0 %v688_v3 }
 0x1ce   : > { %1172 = vmatmul.mubr.f32.gmra.mrb[20].mxu0 %v689_v5  ;;  %v691_v11 = vmax.f32 %v641_v6, 0.0 }
 0x1cf   : > { %v690_v9 = vmax.f32 %v636_v8, 0.0  ;;  %v1123_v10 = vpop.f32.mrb[8].mxu1 }
 0x1d0   : > { %v651_v12 = vadd.f32 %v1123_v10, %v966_v50  ;;  %v645_v13 = vpop.f32.mrb[9].mxu1 }
 0x1d1   : > { %v646_v14 = vadd.f32 %v966_v50, %v645_v13  ;;  %1174 = vmatprep.mubr.f32.mxu0 %v690_v9 }
 0x1d2   : > { %1175 = vmatmul.mubr.f32.gmra.mrb[22].mxu0 %v691_v11  ;;  %v693_v17 = vmax.f32 %v651_v12, 0.0 }
 0x1d3   : > { %v692_v15 = vmax.f32 %v646_v14, 0.0  ;;  %v1126_v16 = vpop.f32.mrb[10].mxu1 }
 0x1d4   : > { %v661_v18 = vadd.f32 %v1126_v16, %v966_v50  ;;  %v655_v19 = vpop.f32.mrb[11].mxu1 }
 0x1d5   : > { %v656_v20 = vadd.f32 %v966_v50, %v655_v19  ;;  %1177 = vmatprep.mubr.f32.mxu0 %v692_v15 }
 0x1d6   : > { %1178 = vmatmul.mubr.f32.gmra.mrb[24].mxu0 %v693_v17  ;;  %v695_v23 = vmax.f32 %v661_v18, 0.0 }
 0x1d7   : > { %v694_v21 = vmax.f32 %v656_v20, 0.0  ;;  %v1129_v22 = vpop.f32.mrb[12].mxu1 }
 0x1d8   : > { %v671_v24 = vadd.f32 %v1129_v22, %v966_v50  ;;  %v665_v25 = vpop.f32.mrb[13].mxu1 }
 0x1d9   : > { %v666_v26 = vadd.f32 %v966_v50, %v665_v25  ;;  %1180 = vmatprep.mubr.f32.mxu0 %v694_v21 }
 0x1da   : > { %1181 = vmatmul.mubr.f32.gmra.mrb[26].mxu0 %v695_v23  ;;  %v697_v29 = vmax.f32 %v671_v24, 0.0 }
 0x1db   : > { %v696_v27 = vmax.f32 %v666_v26, 0.0  ;;  %v1132_v28 = vpop.f32.mrb[14].mxu1 }
 0x1dc   : > { %v681_v30 = vadd.f32 %v1132_v28, %v966_v50  ;;  %v675_v31 = vpop.f32.mrb[15].mxu1 }
 0x1dd   : > { %v676_v32 = vadd.f32 %v966_v50, %v675_v31  ;;  %1183 = vmatprep.mubr.f32.mxu0 %v696_v27 }
 0x1de   : > { %1184 = vmatmul.mubr.f32.gmra.mrb[28].mxu0 %v697_v29  ;;  %v699_v34 = vmax.f32 %v681_v30, 0.0 }
 0x1df   : > { %v698_v33 = vmax.f32 %v676_v32, 0.0 }
 0x1e1   : > { %1186 = vmatprep.mubr.f32.mxu0 %v698_v33 }
 0x1e2   : > { %1187 = vmatmul.mubr.f32.gmra.mrb[30].mxu0 %v699_v34 }
 0x299   : > { %v1167_v36 = vpop.f32.mrb[16].mxu0 }
 0x29a   : > { %v795_v37 = vadd.f32 %v1167_v36, %v967_v35  ;;  %v789_v38 = vpop.f32.mrb[17].mxu0 }
 0x29b   : > { %v790_v39 = vadd.f32 %v967_v35, %v789_v38 }
 0x29c   : > { %869 = vst.msk [vmem:[%s1472_s23 + $0x8] sm:$0xff] %vm306_vm0, %v795_v37 }
 0x29d   : > { %868 = vst.msk [vmem:[%s1472_s23] sm:$0xff] %vm306_vm0, %v790_v39  ;;  %v1170_v40 = vpop.f32.mrb[18].mxu0 }
 0x29e   : > { %v805_v41 = vadd.f32 %v1170_v40, %v967_v35  ;;  %v799_v42 = vpop.f32.mrb[19].mxu0 }
 0x29f   : > { %v800_v43 = vadd.f32 %v967_v35, %v799_v42 }
 0x2a0   : > { %871 = vst.msk [vmem:[%s1472_s23 + $0x18] sm:$0xff] %vm306_vm0, %v805_v41 }
 0x2a1   : > { %870 = vst.msk [vmem:[%s1472_s23 + $0x10] sm:$0xff] %vm306_vm0, %v800_v43  ;;  %v1173_v44 = vpop.f32.mrb[20].mxu0 }
 0x2a2   : > { %v815_v45 = vadd.f32 %v1173_v44, %v967_v35  ;;  %v809_v46 = vpop.f32.mrb[21].mxu0 }
 0x2a3   : > { %v810_v47 = vadd.f32 %v967_v35, %v809_v46 }
 0x2a4   : > { %873 = vst.msk [vmem:[%s1472_s23 + $0x28] sm:$0xff] %vm306_vm0, %v815_v45 }
 0x2a5   : > { %872 = vst.msk [vmem:[%s1472_s23 + $0x20] sm:$0xff] %vm306_vm0, %v810_v47  ;;  %v1176_v48 = vpop.f32.mrb[22].mxu0 }
 0x2a6   : > { %v825_v49 = vadd.f32 %v1176_v48, %v967_v35  ;;  %v819_v50 = vpop.f32.mrb[23].mxu0 }
 0x2a7   : > { %v820_v51 = vadd.f32 %v967_v35, %v819_v50 }
 0x2a8   : > { %875 = vst.msk [vmem:[%s1472_s23 + $0x38] sm:$0xff] %vm306_vm0, %v825_v49 }
 0x2a9   : > { %874 = vst.msk [vmem:[%s1472_s23 + $0x30] sm:$0xff] %vm306_vm0, %v820_v51  ;;  %v1179_v52 = vpop.f32.mrb[24].mxu0 }
 0x2aa   : > { %v835_v53 = vadd.f32 %v1179_v52, %v967_v35  ;;  %v829_v54 = vpop.f32.mrb[25].mxu0 }
 0x2ab   : > { %v830_v55 = vadd.f32 %v967_v35, %v829_v54 }
 0x2ac   : > { %877 = vst.msk [vmem:[%s1472_s23 + $0x48] sm:$0xff] %vm306_vm0, %v835_v53 }
 0x2ad   : > { %876 = vst.msk [vmem:[%s1472_s23 + $0x40] sm:$0xff] %vm306_vm0, %v830_v55  ;;  %v1182_v56 = vpop.f32.mrb[26].mxu0 }
 0x2ae   : > { %v845_v57 = vadd.f32 %v1182_v56, %v967_v35  ;;  %v839_v58 = vpop.f32.mrb[27].mxu0 }
 0x2af   : > { %v840_v59 = vadd.f32 %v967_v35, %v839_v58 }
 0x2b0   : > { %879 = vst.msk [vmem:[%s1472_s23 + $0x58] sm:$0xff] %vm306_vm0, %v845_v57 }
 0x2b1   : > { %878 = vst.msk [vmem:[%s1472_s23 + $0x50] sm:$0xff] %vm306_vm0, %v840_v59  ;;  %v1185_v60 = vpop.f32.mrb[28].mxu0 }
 0x2b2   : > { %v855_v61 = vadd.f32 %v1185_v60, %v967_v35  ;;  %v849_v62 = vpop.f32.mrb[29].mxu0 }
 0x2b3   : > { %v850_v63 = vadd.f32 %v967_v35, %v849_v62 }
 0x2b4   : > { %881 = vst.msk [vmem:[%s1472_s23 + $0x68] sm:$0xff] %vm306_vm0, %v855_v61 }
 0x2b5   : > { %880 = vst.msk [vmem:[%s1472_s23 + $0x60] sm:$0xff] %vm306_vm0, %v850_v63  ;;  %v1188_v0 = vpop.f32.mrb[30].mxu0 }
 0x2b6   : > { %v865_v1 = vadd.f32 %v1188_v0, %v967_v35  ;;  %v859_v2 = vpop.f32.mrb[31].mxu0 }
 0x2b7   : > { %v860_v3 = vadd.f32 %v967_v35, %v859_v2 }
 0x2b8   : > { %883 = vst.msk [vmem:[%s1472_s23 + $0x78] sm:$0xff] %vm306_vm0, %v865_v1 }
 0x2b9   : > { %882 = vst.msk [vmem:[%s1472_s23 + $0x70] sm:$0xff] %vm306_vm0, %v860_v3 }
 0x2ba PF: > { %s17_s24 = sadd.s32 1, %s1267_s24  }
 0x2bb   : > { %p14_p4 = scmp.ge.s32.totalorder %s17_s24, 4  }
 0x2bd   :  { %16 = sbr.rel (!%p14_p4) target bundleno = 1 (0x1), region = 78 }

</bundles_post_ra>
